<compile_context>
chip_gen: v7x
topology: tpu7x:2x2x1
jax: 0.10.0
libtpu: 0.0.40
codegen_flags: <defaults>
</compile_context>

<pallas_src>
import functools

import jax
import jax.numpy as jnp
from jax.experimental import pallas as pl
from jax.experimental.pallas import tpu as pltpu


def _round_up(x, m):
    return (x + m - 1) // m * m


def _gnn_head_kernel(gid_ref, x_ref, w_ref, b_ref, out_ref, acc_ref,
                     *, ones_col, compute_dtype, precision):
    """One node-tile of segment-mean pooling + (on the last tile) the linear head.

    gid_ref : (1, TN)      int32   graph index per node (-1 for padded nodes)
    x_ref   : (TN, D_pad)  compute node features; column `ones_col` is 1.0 for real nodes
    w_ref   : (D_pad, O_pad) compute head weight (zero-padded)
    b_ref   : (1, O_pad)   f32     head bias (zero-padded)
    out_ref : (G, O_pad)   f32     per-graph predictions (written on last tile)
    acc_ref : (G, D_pad)   f32     VMEM accumulator (segment sums + counts)
    """
    t = pl.program_id(0)

    @pl.when(t == 0)
    def _():
        acc_ref[...] = jnp.zeros_like(acc_ref)

    gid = gid_ref[...]                       # (1, TN) int32
    x = x_ref[...]                           # (TN, D_pad)
    n_graphs = acc_ref.shape[0]
    tn = x.shape[0]

    # One-hot assignment rows built on the fly (VPU iota + compare); exact in bf16.
    graph_iota = jax.lax.broadcasted_iota(jnp.int32, (n_graphs, tn), 0)
    assign = (graph_iota == gid).astype(compute_dtype)      # (G, TN)

    # Segment-sum on the MXU.  Column `ones_col` of x is 1.0 for every real node,
    # so acc[:, ones_col] simultaneously accumulates the per-graph node counts.
    acc_ref[...] += jnp.dot(assign, x,
                            preferred_element_type=jnp.float32,
                            precision=precision)

    @pl.when(t == pl.num_programs(0) - 1)
    def _():
        acc = acc_ref[...]                                   # (G, D_pad) f32
        counts = acc[:, ones_col:ones_col + 1]               # (G, 1)
        pooled = acc / jnp.maximum(counts, 1.0)              # global mean pool
        out = jnp.dot(pooled.astype(compute_dtype), w_ref[...],
                      preferred_element_type=jnp.float32,
                      precision=precision)
        out_ref[...] = out + b_ref[...]


def gnn_head_forward(node_representation, graph_index, weight, bias,
                     num_graphs, task, num_tasks, num_classes,
                     *, tile_nodes=1024, compute_dtype=jnp.bfloat16):
    """Fused global-mean-pool + linear head.

    node_representation : (N, D) float  weight : (D, O)  bias : (O,)
    graph_index         : (N,)   int    O = num_tasks * num_classes (classification)
    """
    n_nodes, emb_dim = node_representation.shape
    out_dim = weight.shape[1]
    cdt = jnp.dtype(compute_dtype)

    # ---- lane-aligned padding (feature dim reserves column 0 for the counts) ----
    d_pad = _round_up(emb_dim + 1, 128)
    o_pad = _round_up(out_dim, 128)

    # ---- node-axis tile: lane-aligned for multi-tile, full array for single tile ----
    if n_nodes <= tile_nodes:
        tn = _round_up(n_nodes, 8)            # single tile == full padded array
    else:
        tn = _round_up(tile_nodes, 128)       # gid block last dim must be lane-aligned
    n_pad = _round_up(n_nodes, tn)
    num_tiles = n_pad // tn

    # ---- host-side padding / packing ----
    x = jnp.zeros((n_pad, d_pad), cdt)
    x = x.at[:n_nodes, 0].set(jnp.ones((n_nodes,), cdt))              # counts column
    x = x.at[:n_nodes, 1:1 + emb_dim].set(node_representation.astype(cdt))

    gid = jnp.full((1, n_pad), -1, jnp.int32)                         # -1 matches no graph
    gid = gid.at[0, :n_nodes].set(graph_index.astype(jnp.int32))

    w = jnp.zeros((d_pad, o_pad), cdt)
    w = w.at[1:1 + emb_dim, :out_dim].set(weight.astype(cdt))
    b = jnp.zeros((1, o_pad), jnp.float32)
    b = b.at[0, :out_dim].set(bias.astype(jnp.float32))

    precision = (jax.lax.Precision.HIGHEST if cdt == jnp.dtype(jnp.float32)
                 else jax.lax.Precision.DEFAULT)

    kernel = functools.partial(_gnn_head_kernel,
                               ones_col=0,
                               compute_dtype=cdt,
                               precision=precision)

    # ---- explicit scoped-VMEM budget (double-buffered tiles + accumulator) ----
    itemsize = cdt.itemsize
    vmem_est = (
        2 * tn * d_pad * itemsize          # x tiles (double-buffered)
        + 2 * tn * 4                       # gid tiles
        + 2 * d_pad * o_pad * itemsize     # head weight
        + 2 * o_pad * 4                    # bias
        + 2 * num_graphs * o_pad * 4       # output block
        + num_graphs * d_pad * 4           # accumulator scratch
        + num_graphs * tn * 4              # in-kernel assign temporary (upper bound)
    )
    vmem_limit = int(min(max(2 * vmem_est, 32 << 20), 48 << 20))  # safe on v5e/v6e/v7x

    out = pl.pallas_call(
        kernel,
        out_shape=jax.ShapeDtypeStruct((num_graphs, o_pad), jnp.float32),
        grid_spec=pltpu.PrefetchScalarGridSpec(
            num_scalar_prefetch=0,
            grid=(num_tiles,),
            in_specs=[
                pl.BlockSpec((1, tn), lambda t: (0, t)),          # graph ids
                pl.BlockSpec((tn, d_pad), lambda t: (t, 0)),      # node features
                pl.BlockSpec((d_pad, o_pad), lambda t: (0, 0)),   # head weight
                pl.BlockSpec((1, o_pad), lambda t: (0, 0)),       # head bias
            ],
            out_specs=pl.BlockSpec((num_graphs, o_pad), lambda t: (0, 0)),
            scratch_shapes=[pltpu.VMEM((num_graphs, d_pad), jnp.float32)],
        ),
        compiler_params=pltpu.CompilerParams(
            dimension_semantics=("arbitrary",),   # node axis is a reduction
            vmem_limit_bytes=vmem_limit,
        ),
    )(gid, x, w, b)

    out = out[:, :out_dim]
    if task == "classification":
        out = out.reshape(-1, num_tasks, num_classes)
    return out


def _reference(node_representation, graph_index, weight, bias,
               num_graphs, task, num_tasks, num_classes):
    pooled = jax.ops.segment_sum(node_representation, graph_index,
                                 num_segments=num_graphs)
    counts = jax.ops.segment_sum(jnp.ones((node_representation.shape[0], 1),
                                          jnp.float32),
                                 graph_index, num_segments=num_graphs)
    pooled = pooled / jnp.maximum(counts, 1.0)
    out = pooled @ weight + bias
    if task == "classification":
        out = out.reshape(-1, num_tasks, num_classes)
    return out


if __name__ == "__main__":
    key = jax.random.PRNGKey(0)

    # ---- case 1: classification head, sorted graph_index, single node tile ----
    num_graphs = 8
    nodes_per_graph = 4
    num_nodes = num_graphs * nodes_per_graph       # 32
    emb_dim = 32
    num_tasks = 3
    num_classes = 2
    out_dim = num_tasks * num_classes
    task = "classification"

    k_x, k_w, k_b, k_x2, k_g2, k_w2, k_b2 = jax.random.split(key, 7)

    node_repr = jax.random.normal(k_x, (num_nodes, emb_dim), jnp.float32)
    graph_index = jnp.repeat(jnp.arange(num_graphs, dtype=jnp.int32), nodes_per_graph)
    weight = jax.random.normal(k_w, (emb_dim, out_dim), jnp.float32) * 0.1
    bias = jax.random.normal(k_b, (out_dim,), jnp.float32) * 0.1

    ref = _reference(node_repr, graph_index, weight, bias,
                     num_graphs, task, num_tasks, num_classes)

    # Exact f32 path (strict check).
    out_f32 = gnn_head_forward(node_repr, graph_index, weight, bias,
                               num_graphs, task, num_tasks, num_classes,
                               compute_dtype=jnp.float32)
    out_f32 = jax.block_until_ready(out_f32)
    assert out_f32.shape == (num_graphs, num_tasks, num_classes)
    assert jnp.allclose(out_f32, ref, atol=1e-5, rtol=1e-5)

    # Default bandwidth-optimized bf16 path (looser tolerance: bf16 inputs).
    out_bf16 = gnn_head_forward(node_repr, graph_index, weight, bias,
                                num_graphs, task, num_tasks, num_classes)
    out_bf16 = jax.block_until_ready(out_bf16)
    assert out_bf16.shape == (num_graphs, num_tasks, num_classes)
    assert jnp.allclose(out_bf16, ref, atol=3e-2, rtol=3e-2)

    # ---- case 2: regression head, unsorted graph_index, multi-tile node axis ----
    num_nodes2, num_graphs2, num_tasks2 = 300, 5, 4
    task2 = "regression"
    node_repr2 = jax.random.normal(k_x2, (num_nodes2, emb_dim), jnp.float32)
    graph_index2 = jax.random.randint(k_g2, (num_nodes2,), 0, num_graphs2, jnp.int32)
    weight2 = jax.random.normal(k_w2, (emb_dim, num_tasks2), jnp.float32) * 0.1
    bias2 = jax.random.normal(k_b2, (num_tasks2,), jnp.float32) * 0.1

    ref2 = _reference(node_repr2, graph_index2, weight2, bias2,
                      num_graphs2, task2, num_tasks2, 1)
    out2 = gnn_head_forward(node_repr2, graph_index2, weight2, bias2,
                            num_graphs2, task2, num_tasks2, 1,
                            tile_nodes=128, compute_dtype=jnp.float32)
    out2 = jax.block_until_ready(out2)
    assert out2.shape == (num_graphs2, num_tasks2)
    assert jnp.allclose(out2, ref2, atol=1e-5, rtol=1e-5)

    print("KERNEL_OK")
</pallas_src>

<mosaic_0001>
module attributes {stable_mosaic.version = 11 : i64} {
  func.func @_gnn_head_kernel(%arg0: i32, %arg1: memref<1x32xi32, #tpu.memory_space<vmem>>, %arg2: memref<32x128xf32, #tpu.memory_space<vmem>>, %arg3: memref<128x128xf32, #tpu.memory_space<vmem>>, %arg4: memref<1x128xf32, #tpu.memory_space<vmem>>, %arg5: memref<8x128xf32, #tpu.memory_space<vmem>>, %arg6: memref<8x128xf32, #tpu.memory_space<vmem>>) attributes {dimension_semantics = [#tpu.dimension_semantics<arbitrary>], iteration_bounds = array<i64: 1>, scalar_prefetch = 0 : i64, scratch_operands = 1 : i64, tpu.core_type = #tpu.core_type<tc>, window_params = [{transform_indices = @transform_0, window_bounds = array<i64: 1, 32>}, {transform_indices = @transform_1, window_bounds = array<i64: 32, 128>}, {pipeline_mode = #tpu.pipeline_mode<synchronous>, transform_indices = @transform_2, window_bounds = array<i64: 128, 128>}, {pipeline_mode = #tpu.pipeline_mode<synchronous>, transform_indices = @transform_3, window_bounds = array<i64: 1, 128>}, {pipeline_mode = #tpu.pipeline_mode<synchronous>, transform_indices = @transform_4, window_bounds = array<i64: 8, 128>}]} {
    %c0_i32 = arith.constant 0 : i32
    %0 = arith.cmpi eq, %arg0, %c0_i32 : i32
    %1 = arith.extui %0 : i1 to i32
    %c0_i32_0 = arith.constant 0 : i32
    %2 = arith.cmpi ne, %1, %c0_i32_0 : i32
    scf.if %2 {
      %cst_10 = arith.constant 0.000000e+00 : f32
      %17 = vector.broadcast %cst_10 : f32 to vector<8x128xf32>
      %c0_11 = arith.constant 0 : index
      %c0_12 = arith.constant 0 : index
      %18 = vector.load %arg6[%c0_11, %c0_12] : memref<8x128xf32, #tpu.memory_space<vmem>>, vector<8x128xf32>
      tpu.vector_store %arg6[%c0_11, %c0_12], %17 {strides = array<i32>} : memref<8x128xf32, #tpu.memory_space<vmem>>, vector<8x128xf32>,
    } else {
    }
    %c0 = arith.constant 0 : index
    %c0_1 = arith.constant 0 : index
    %3 = vector.load %arg1[%c0, %c0_1] : memref<1x32xi32, #tpu.memory_space<vmem>>, vector<1x32xi32>
    %c0_2 = arith.constant 0 : index
    %c0_3 = arith.constant 0 : index
    %4 = vector.load %arg2[%c0_2, %c0_3] : memref<32x128xf32, #tpu.memory_space<vmem>>, vector<32x128xf32>
    %5 = tpu.iota {dimensions = array<i32: 0>} : vector<8x32xi32>
    %6 = vector.broadcast %3 : vector<1x32xi32> to vector<8x32xi32>
    %7 = arith.cmpi eq, %5, %6 : vector<8x32xi32>
    %8 = arith.extui %7 : vector<8x32xi1> to vector<8x32xi32>
    %9 = arith.sitofp %8 : vector<8x32xi32> to vector<8x32xf32>
    %c0_4 = arith.constant 0 : index
    %c0_5 = arith.constant 0 : index
    %10 = vector.load %arg6[%c0_4, %c0_5] : memref<8x128xf32, #tpu.memory_space<vmem>>, vector<8x128xf32>
    %cst = arith.constant dense<0.000000e+00> : vector<8x128xf32>
    %11 = tpu.matmul %9, %4, %cst {dimension_numbers = #tpu.dot_dimension_numbers<[1], [0], [0], [1], [0, 0, 1, 1], [], []>, precision = #tpu.contract_precision<fp32>} : vector<8x32xf32>, vector<32x128xf32>, vector<8x128xf32> -> vector<8x128xf32>
    %12 = arith.addf %10, %11 : vector<8x128xf32>
    %c0_6 = arith.constant 0 : index
    %c0_7 = arith.constant 0 : index
    %13 = vector.load %arg6[%c0_6, %c0_7] : memref<8x128xf32, #tpu.memory_space<vmem>>, vector<8x128xf32>
    tpu.vector_store %arg6[%c0_6, %c0_7], %12 {strides = array<i32>} : memref<8x128xf32, #tpu.memory_space<vmem>>, vector<8x128xf32>,
    %c0_i32_8 = arith.constant 0 : i32
    %14 = arith.cmpi eq, %arg0, %c0_i32_8 : i32
    %15 = arith.extui %14 : i1 to i32
    %c0_i32_9 = arith.constant 0 : i32
    %16 = arith.cmpi ne, %15, %c0_i32_9 : i32
    scf.if %16 {
      %c0_10 = arith.constant 0 : index
      %c0_11 = arith.constant 0 : index
      %17 = vector.load %arg6[%c0_10, %c0_11] : memref<8x128xf32, #tpu.memory_space<vmem>>, vector<8x128xf32>
      %18 = vector.extract_strided_slice %17 {offsets = [0, 0], sizes = [8, 1], strides = [1, 1]} : vector<8x128xf32> to vector<8x1xf32>
      %cst_12 = arith.constant 1.000000e+00 : f32
      %19 = vector.broadcast %cst_12 : f32 to vector<8x1xf32>
      %20 = arith.maximumf %18, %19 : vector<8x1xf32>
      %21 = vector.broadcast %20 : vector<8x1xf32> to vector<8x128xf32>
      %22 = arith.divf %17, %21 : vector<8x128xf32>
      %c0_13 = arith.constant 0 : index
      %c0_14 = arith.constant 0 : index
      %23 = vector.load %arg3[%c0_13, %c0_14] : memref<128x128xf32, #tpu.memory_space<vmem>>, vector<128x128xf32>
      %cst_15 = arith.constant dense<0.000000e+00> : vector<8x128xf32>
      %24 = tpu.matmul %22, %23, %cst_15 {dimension_numbers = #tpu.dot_dimension_numbers<[1], [0], [0], [1], [0, 0, 1, 1], [], []>, precision = #tpu.contract_precision<fp32>} : vector<8x128xf32>, vector<128x128xf32>, vector<8x128xf32> -> vector<8x128xf32>
      %c0_16 = arith.constant 0 : index
      %c0_17 = arith.constant 0 : index
      %25 = vector.load %arg4[%c0_16, %c0_17] : memref<1x128xf32, #tpu.memory_space<vmem>>, vector<1x128xf32>
      %26 = vector.broadcast %25 : vector<1x128xf32> to vector<8x128xf32>
      %27 = arith.addf %24, %26 : vector<8x128xf32>
      %c0_18 = arith.constant 0 : index
      %c0_19 = arith.constant 0 : index
      %28 = vector.load %arg5[%c0_18, %c0_19] : memref<8x128xf32, #tpu.memory_space<vmem>>, vector<8x128xf32>
      tpu.vector_store %arg5[%c0_18, %c0_19], %27 {strides = array<i32>} : memref<8x128xf32, #tpu.memory_space<vmem>>, vector<8x128xf32>,
    } else {
    }
    return
  }
  func.func @transform_0(%arg0: i32) -> (i32, i32) {
    %c0_i32 = arith.constant 0 : i32
    %c0_i32_0 = arith.constant 0 : i32
    return %c0_i32, %arg0 : i32, i32
  }
  func.func @transform_1(%arg0: i32) -> (i32, i32) {
    %c0_i32 = arith.constant 0 : i32
    %c0_i32_0 = arith.constant 0 : i32
    return %arg0, %c0_i32 : i32, i32
  }
  func.func @transform_2(%arg0: i32) -> (i32, i32) {
    %c0_i32 = arith.constant 0 : i32
    %c0_i32_0 = arith.constant 0 : i32
    %c0_i32_1 = arith.constant 0 : i32
    return %c0_i32, %c0_i32_0 : i32, i32
  }
  func.func @transform_3(%arg0: i32) -> (i32, i32) {
    %c0_i32 = arith.constant 0 : i32
    %c0_i32_0 = arith.constant 0 : i32
    %c0_i32_1 = arith.constant 0 : i32
    return %c0_i32, %c0_i32_0 : i32, i32
  }
  func.func @transform_4(%arg0: i32) -> (i32, i32) {
    %c0_i32 = arith.constant 0 : i32
    %c0_i32_0 = arith.constant 0 : i32
    %c0_i32_1 = arith.constant 0 : i32
    return %c0_i32, %c0_i32_0 : i32, i32
  }
}

</mosaic_0001>

<bundles_post_ra>
// kernel: tpu_custom_call.1
= control target key start
LH: loop header
LB: loop body
LE: loop exit
PB: predicated region body
PF: predicated region fallthrough
CT: control target
= control target key end

     0   :  { %9 = vsyncpa [#allocation4], 0  ;;  %s2317_s0 = inlined_call_operand.hbm [shape: s32[1,32], index: 0, kind: input, shape index: {}]   ;;  %s2318_s1 = inlined_call_operand.hbm [shape: f32[32,128], index: 1, kind: input, shape index: {}]   ;;  %s2319_s2 = inlined_call_operand.hbm [shape: f32[128,128], index: 2, kind: input, shape index: {}]   ;;  %s2320_s3 = inlined_call_operand.vmem [shape: f32[1,128], index: 3, kind: input, shape index: {}]   ;;  %s2321_s4 = inlined_call_operand.hbm [shape: f32[8,128], index: 4, kind: output, shape index: {}]  }
   0x1   :  { %10 = vsyncpa [#allocation7], 0 }
   0x2   :  { %11 = vsyncpa [#allocation5], 0  ;;  %s1982_s15 = smov [#allocation6]   ;;  %s1888_s19 = scalar_lea.hbm %s2318_s1, 512 }
   0x3   :  { %s27_s16 = sshll.u32 %s1982_s15, 4  ;;  %p1889_p0 = scmp.ne.s32.totalorder %s2318_s1, %s1888_s19  ;;  %s28_s16 = int_to_ptr.vmem [resolvable:$true] %s27_s16 }
   0x4   :  { %p1892_p1 = scmp.lt.u32.totalorder %s1888_s19, %s2318_s1 }
   0x6   :  { %p1894_p2 = pnand %p1892_p1, %p1889_p0 }
   0x8   :  { %1897 = shalt.err (!%p1894_p2)
}
   0x9   :  { %s1898_s24 = scalar_lea.vmem %s28_s16, 512  ;;  %p1903_p4 = scmp.lt.s32.totalorder %s28_s16, %s28_s16 }
   0xa   :  { %p1899_p3 = scmp.ne.s32.totalorder %s28_s16, %s1898_s24  ;;  %p1904_p5 = scmp.lt.s32.totalorder %s1898_s24, %s1898_s24 }
   0xc   :  { %p1905_p6 = por %p1904_p5, %p1903_p4 }
   0xe   :  { %p1906_p7 = pnand %p1905_p6, %p1899_p3 }
  0x10   :  { %1909 = shalt.err (!%p1906_p7)
}
  0x11   :  { %s1983_s25 = smov 128   ;;  %s1984_s26 = smov 8  }
  0x12   :  { %33 = dma.hbm_to_vmem [thread:$0]  %s2318_s1, 512, %s28_s16, [#allocation7], %s1983_s25, %s1983_s25, %s1984_s26  }
  0x13   :  { %s1985_s29 = smov [#allocation3]   ;;  %s1986_s5 = smov [#allocation8]  }
  0x14   :  { %s18_s30 = sshll.u32 %s1985_s29, 4  ;;  %s39_s6 = sshll.u32 %s1986_s5, 4  ;;  %s19_s30 = int_to_ptr.vmem [resolvable:$true] %s18_s30  ;;  %s40_s6 = int_to_ptr.vmem [resolvable:$true] %s39_s6 }
  0x15   :  { %s1910_s9 = scalar_lea.hbm %s2317_s0, 16 }
  0x16   :  { %p1911_p8 = scmp.ne.s32.totalorder %s2317_s0, %s1910_s9  ;;  %p1914_p9 = scmp.lt.u32.totalorder %s1910_s9, %s2317_s0 }
  0x18   :  { %p1916_p10 = pnand %p1914_p9, %p1911_p8 }
  0x1a   :  { %1919 = shalt.err (!%p1916_p10)
}
  0x1b   :  { %s1920_s1 = scalar_lea.vmem %s19_s30, 16  ;;  %s1924_s14 = scalar_lea.vmem %s19_s30, 32 }
  0x1c   :  { %p1921_p11 = scmp.ne.s32.totalorder %s19_s30, %s1920_s1  ;;  %p1925_p12 = scmp.lt.s32.totalorder %s19_s30, %s19_s30 }
  0x1d   :  { %p1926_p13 = scmp.lt.s32.totalorder %s1924_s14, %s1920_s1 }
  0x1f   :  { %p1927_p0 = por %p1926_p13, %p1925_p12 }
  0x21   :  { %p1928_p1 = pnand %p1927_p0, %p1921_p11 }
  0x23   :  { %1931 = shalt.err (!%p1928_p1)
}
  0x24   :  { %21 = dma.hbm_to_vmem [thread:$0]  %s2317_s0, 16, %s19_s30, [#allocation4]  }
  0x25   :  { %s1932_s19 = scalar_lea.hbm %s2319_s2, 2048 }
  0x26   :  { %p1933_p2 = scmp.ne.s32.totalorder %s2319_s2, %s1932_s19  ;;  %p1936_p3 = scmp.lt.u32.totalorder %s1932_s19, %s2319_s2 }
  0x28   :  { %p1938_p4 = pnand %p1936_p3, %p1933_p2 }
  0x2a   :  { %1941 = shalt.err (!%p1938_p4)
}
  0x2b   :  { %s1942_s24 = scalar_lea.vmem %s40_s6, 2048  ;;  %p1947_p6 = scmp.lt.s32.totalorder %s40_s6, %s40_s6 }
  0x2c   :  { %p1943_p5 = scmp.ne.s32.totalorder %s40_s6, %s1942_s24  ;;  %p1948_p7 = scmp.lt.s32.totalorder %s1942_s24, %s1942_s24 }
  0x2e   :  { %p1949_p8 = por %p1948_p7, %p1947_p6 }
  0x30   :  { %p1950_p9 = pnand %p1949_p8, %p1943_p5 }
  0x32   :  { %1953 = shalt.err (!%p1950_p9)
}
  0x33   :  { %45 = dma.hbm_to_vmem [thread:$0]  %s2319_s2, 2048, %s40_s6, [#allocation7], %s1983_s25, %s1983_s25, %s1984_s26  }
  0x34   :  { %1976 = dma.done.wait [#allocation4], 16  }
  0x35   :  { %1977 = vsyncadd [#allocation4], 4294967280 }
  0x36   :  { %1978 = dma.done.wait [#allocation7], 2560  }
  0x37   :  { %1979 = vsyncadd [#allocation7], 4294964736  ;;  %v1987_v0 = vmov 0.0|0.0   ;;  %vm1988_vm0 = vmmov 0   ;;  %v1989_v1 = vmov 0.0   ;;  %v67_v2 = vlaneseq  ;;  %v63_v4 = vld [vmem:[#allocation6] sm:$0xff] }
  0x38   :  { %1675 = vmatprep.subr.bf16.mxu0 %v1987_v0  ;;  %1407 = vmatprep.mubr.msk.f32.mxu0 %vm1988_vm0, %v1989_v1  ;;  %v64_v5 = vld [vmem:[#allocation6 + $0x8] sm:$0xff]  ;;  %v65_v6 = vld [vmem:[#allocation6 + $0x10] sm:$0xff]  ;;  %v82_v7 = vand.u32 4294901760, %v63_v4  ;;  %v66_v9 = vld [vmem:[#allocation6 + $0x18] sm:$0xff]  ;;  %vm77_vm2 = vcmask 261120   ;;  %v1990_v43 = vmov 0  }
  0x39   :  { %1759 = vmatprep.subr.bf16.mxu1 %v1987_v0  ;;  %1567 = vmatprep.mubr.msk.f32.mxu1 %vm1988_vm0, %v1989_v1  ;;  %v68_v3 = vshrl.u32 %v67_v2, 7  ;;  %v85_v8 = vand.u32 4294901760, %v64_v5  ;;  %v88_v10 = vand.u32 4294901760, %v65_v6  ;;  %v1261_v11 = vld [vmem:[#allocation3] ss:$0 sm:$0xff]  ;;  %v91_v12 = vand.u32 4294901760, %v66_v9 }
  0x3a   :  { %v162_v14 = vsub.f32 %v63_v4, %v82_v7  ;;  %1885 = vset.pattern.permute.xlu0 %v1990_v43  ;;  %v580_v44 = vld [vmem:[#allocation8] sm:$0xff]  ;;  %v581_v45 = vld [vmem:[#allocation8 + $0x8] sm:$0xff]  ;;  %v582_v46 = vld [vmem:[#allocation8 + $0x10] sm:$0xff]  ;;  %s1991_s26 = smov [#allocation9]  }
  0x3b   :  { %vm73_vm1 = vcmp.eq.s32.totalorder %v68_v3, %v1261_v11  ;;  %v1676_v13 = vpack.c.bf16 %v85_v8, %v82_v7  ;;  %v169_v15 = vsub.f32 %v64_v5, %v85_v8  ;;  %v176_v16 = vsub.f32 %v65_v6, %v88_v10  ;;  %v583_v49 = vld [vmem:[#allocation8 + $0x18] sm:$0xff]  ;;  %v584_v51 = vld [vmem:[#allocation8 + $0x20] sm:$0xff]  ;;  %v585_v52 = vld [vmem:[#allocation8 + $0x28] sm:$0xff]  ;;  %s1251_s28 = sshll.u32 %s1991_s26, 4  ;;  %s1252_s28 = int_to_ptr.vmem [resolvable:$true] %s1251_s28 }
  0x3c   :  { %v1679_v17 = vpack.c.bf16 %v91_v12, %v88_v10  ;;  %v183_v18 = vsub.f32 %v66_v9, %v91_v12  ;;  %v1262_v19 = vsel %vm73_vm1, 1.0, %v1989_v1  ;;  %v163_v21 = vand.u32 4294901760, %v162_v14  ;;  %v586_v61 = vld [vmem:[#allocation8 + $0x30] sm:$0xff]  ;;  %v587_v62 = vld [vmem:[#allocation8 + $0x38] sm:$0xff]  ;;  %s1954_s29 = scalar_lea.vmem %s1252_s28, 128  ;;  %p1959_p11 = scmp.lt.s32.totalorder %s1252_s28, %s1252_s28 }
  0x3d   :  { %1677 = vmatpush3.bf16.msra.mxu0 %v1676_v13  ;;  %v79_v20 = vsel %vm77_vm2, %v1262_v19, 0  ;;  %v170_v22 = vand.u32 4294901760, %v169_v15  ;;  %v177_v23 = vand.u32 4294901760, %v176_v16  ;;  %v1688_v39 = vpack.c.bf16 %v169_v15, %v162_v14  ;;  %p1955_p10 = scmp.ne.s32.totalorder %s1252_s28, %s1954_s29  ;;  %p1960_p12 = scmp.lt.s32.totalorder %s1954_s29, %s1954_s29 }
  0x3e   :  { %1678 = vmatprep.subr.bf16.mxu0 %v1987_v0  ;;  %v151_v24 = vsub.f32 %v79_v20, %v79_v20  ;;  %v184_v25 = vand.u32 4294901760, %v183_v18  ;;  %v164_v26 = vsub.f32 %v162_v14, %v163_v21  ;;  %v1691_v40 = vpack.c.bf16 %v183_v18, %v176_v16  ;;  %v589_v14 = vld [vmem:[#allocation8 + $0x48] sm:$0xff] }
  0x3f   :  { %v171_v27 = vsub.f32 %v169_v15, %v170_v22  ;;  %v178_v28 = vsub.f32 %v176_v16, %v177_v23  ;;  %v1700_v41 = vpack.c.bf16 %v170_v22, %v163_v21  ;;  %v604_v47 = vand.u32 4294901760, %v580_v44  ;;  %v590_v22 = vld [vmem:[#allocation8 + $0x50] sm:$0xff]  ;;  %p1961_p13 = por %p1960_p12, %p1959_p11 }
  0x40   :  { %v152_v29 = vand.u32 4294901760, %v151_v24  ;;  %v185_v30 = vsub.f32 %v183_v18, %v184_v25  ;;  %v165_v31 = vand.u32 4294901760, %v164_v26  ;;  %v1703_v42 = vpack.c.bf16 %v184_v25, %v177_v23  ;;  %v591_v23 = vld [vmem:[#allocation8 + $0x58] sm:$0xff] }
  0x41   :  { %1680 = vmatpush3.bf16.msra.mxu0 %v1679_v17  ;;  %v172_v32 = vand.u32 4294901760, %v171_v27  ;;  %v179_v35 = vand.u32 4294901760, %v178_v28  ;;  %v607_v48 = vand.u32 4294901760, %v581_v45  ;;  %v610_v50 = vand.u32 4294901760, %v582_v46  ;;  %v592_v28 = vld [vmem:[#allocation8 + $0x60] sm:$0xff]  ;;  %p1962_p0 = pnand %p1961_p13, %p1955_p10 }
  0x42   :  { %v153_v33 = vsub.f32 %v151_v24, %v152_v29  ;;  %1681 = vmatprep.subr.bf16.mxu0 %v1987_v0  ;;  %v186_v36 = vand.u32 4294901760, %v185_v30  ;;  %v613_v53 = vand.u32 4294901760, %v583_v49  ;;  %v616_v54 = vand.u32 4294901760, %v584_v51  ;;  %v594_v30 = vld [vmem:[#allocation8 + $0x70] sm:$0xff] }
  0x43   :  { %v1682_v34 = vpack.c.bf16 %v172_v32, %v165_v31  ;;  %v619_v55 = vand.u32 4294901760, %v585_v52  ;;  %v2094_v56 = vsub.f32 %v580_v44, %v604_v47  ;;  %v2096_v57 = vsub.f32 %v581_v45, %v607_v48 }
  0x44   :  { %v154_v37 = vand.u32 4294901760, %v153_v33  ;;  %v1685_v38 = vpack.c.bf16 %v186_v36, %v179_v35  ;;  %v2098_v58 = vsub.f32 %v582_v46, %v610_v50  ;;  %v2100_v59 = vpack.c.bf16 %v607_v48, %v604_v47  ;;  %v595_v35 = vld [vmem:[#allocation8 + $0x78] sm:$0xff] }
  0x45   :  { %v2102_v60 = vsub.f32 %v583_v49, %v613_v53  ;;  %v1760_v63 = vpack.c.bf16 %v2096_v57, %v2094_v56  ;;  %v2107_v2 = vpack.c.bf16 %v613_v53, %v610_v50  ;;  %v2109_v3 = vsub.f32 %v584_v51, %v616_v54 }
  0x46   :  { %1408 = vmatmul.mubr.f32.vlgmr.msra.gmra.mrb[0].mxu0 %v154_v37  ;;  %v2114_v5 = vsub.f32 %v585_v52, %v619_v55  ;;  %v622_v6 = vand.u32 4294901760, %v586_v61  ;;  %v625_v7 = vand.u32 4294901760, %v587_v62  ;;  %v2118_v8 = vpack.c.bf16 %v619_v55, %v616_v54 }
  0x47   :  { %1683 = vmatpush3.bf16.msra.mxu0 %v1682_v34  ;;  %1418 = vmatprep.mubr.msk.f32.mxu0 %vm1988_vm0, %v1989_v1  ;;  %v1763_v4 = vpack.c.bf16 %v2102_v60, %v2098_v58  ;;  %v631_v16 = vand.u32 4294901760, %v589_v14  ;;  %v634_v25 = vand.u32 4294901760, %v590_v22  ;;  %v637_v26 = vand.u32 4294901760, %v591_v23 }
  0x48   :  { %1684 = vmatprep.subr.bf16.mxu0 %v1987_v0  ;;  %1761 = vmatpush3.bf16.msra.mxu1 %v1760_v63  ;;  %v1766_v9 = vpack.c.bf16 %v2114_v5, %v2109_v3  ;;  %v2123_v10 = vsub.f32 %v586_v61, %v622_v6  ;;  %v2125_v11 = vsub.f32 %v587_v62, %v625_v7  ;;  %v640_v33 = vand.u32 4294901760, %v592_v28 }
  0x49   :  { %1762 = vmatprep.subr.bf16.mxu1 %v1987_v0  ;;  %v2143_v27 = vpack.c.bf16 %v625_v7, %v622_v6  ;;  %v2145_v31 = vsub.f32 %v590_v22, %v634_v25  ;;  %v2147_v32 = vsub.f32 %v591_v23, %v637_v26  ;;  %v646_v37 = vand.u32 4294901760, %v594_v30 }
  0x4a   :  { %v1769_v12 = vpack.c.bf16 %v2125_v11, %v2123_v10  ;;  %v2158_v45 = vpack.c.bf16 %v637_v26, %v634_v25 }
  0x4b   :  { %1686 = vmatpush3.bf16.msra.mxu0 %v1685_v38  ;;  %v649_v38 = vand.u32 4294901760, %v595_v35  ;;  %v794_v43 = vsub.f32 %v594_v30, %v646_v37  ;;  %v767_v55 = vand.u32 4294901760, %v2145_v31  ;;  %v774_v61 = vand.u32 4294901760, %v2147_v32 }
  0x4c   :  { %1687 = vmatprep.subr.bf16.mxu0 %v1987_v0  ;;  %1764 = vmatpush3.bf16.msra.mxu1 %v1763_v4 }
  0x4d   :  { %1765 = vmatprep.subr.bf16.mxu1 %v1987_v0  ;;  %v801_v44 = vsub.f32 %v595_v35, %v649_v38  ;;  %v2169_v48 = vpack.c.bf16 %v649_v38, %v646_v37  ;;  %v768_v63 = vsub.f32 %v2145_v31, %v767_v55  ;;  %v775_v4 = vsub.f32 %v2147_v32, %v774_v61 }
  0x4e   :  { %1419 = vmatmul.mubr.msk.f32.vlgmr.msra.gmra.mrb[0].mxu0 %vm77_vm2, %v1262_v19 }
  0x4f   :  { %1689 = vmatpush3.bf16.msra.mxu0 %v1688_v39  ;;  %1429 = vmatprep.mubr.msk.f32.mxu0 %vm1988_vm0, %v1989_v1  ;;  %v1775_v39 = vpack.c.bf16 %v2147_v32, %v2145_v31  ;;  %v1781_v46 = vpack.c.bf16 %v801_v44, %v794_v43  ;;  %v769_v6 = vand.u32 4294901760, %v768_v63  ;;  %v776_v7 = vand.u32 4294901760, %v775_v4 }
  0x50   :  { %1690 = vmatprep.subr.bf16.mxu0 %v1987_v0  ;;  %1767 = vmatpush3.bf16.msra.mxu1 %v1766_v9 }
  0x51   :  { %1768 = vmatprep.subr.bf16.mxu1 %v1987_v0 }
  0x53   :  { %1692 = vmatpush3.bf16.msra.mxu0 %v1691_v40  ;;  %v780_v40 = vsub.f32 %v592_v28, %v640_v33 }
  0x54   :  { %1693 = vmatprep.subr.bf16.mxu0 %v1987_v0  ;;  %1770 = vmatpush3.bf16.msra.mxu1 %v1769_v12 }
  0x55   :  { %1771 = vmatprep.subr.bf16.mxu1 %v1987_v0  ;;  %v781_v9 = vand.u32 4294901760, %v780_v40 }
  0x56   :  { %1430 = vmatmul.mubr.f32.vlgmr.msra.gmra.mrb[0].mxu0 %v151_v24 }
  0x57   :  { %1695 = vmatpush3.bf16.msra.mxu0 %v1676_v13  ;;  %1440 = vmatprep.mubr.msk.f32.mxu0 %vm1988_vm0, %v1989_v1 }
  0x58   :  { %1696 = vmatprep.subr.bf16.mxu0 %v1987_v0 }
  0x5b   :  { %1698 = vmatpush3.bf16.msra.mxu0 %v1679_v17 }
  0x5c   :  { %1699 = vmatprep.subr.bf16.mxu0 %v1987_v0 }
  0x5e   :  { %1441 = vmatmul.mubr.f32.vlgmr.msra.gmra.mrb[0].mxu0 %v152_v29  ;;  %v593_v29 = vld [vmem:[#allocation8 + $0x68] sm:$0xff] }
  0x5f   :  { %1701 = vmatpush3.bf16.msra.mxu0 %v1700_v41  ;;  %1451 = vmatprep.mubr.msk.f32.mxu0 %vm1988_vm0, %v1989_v1  ;;  %v643_v34 = vand.u32 4294901760, %v593_v29 }
  0x60   :  { %1702 = vmatprep.subr.bf16.mxu0 %v1987_v0 }
  0x61   :  { %v787_v41 = vsub.f32 %v593_v29, %v643_v34  ;;  %v2163_v47 = vpack.c.bf16 %v643_v34, %v640_v33  ;;  %v2191_v29 = vpack.c.bf16 %v774_v61, %v767_v55  ;;  %v697_v33 = vand.u32 4294901760, %v2094_v56 }
  0x62   :  { %v704_v34 = vand.u32 4294901760, %v2096_v57 }
  0x63   :  { %1704 = vmatpush3.bf16.msra.mxu0 %v1703_v42  ;;  %v1778_v42 = vpack.c.bf16 %v787_v41, %v780_v40  ;;  %v788_v12 = vand.u32 4294901760, %v787_v41  ;;  %v698_v37 = vsub.f32 %v2094_v56, %v697_v33 }
  0x64   :  { %1705 = vmatprep.subr.bf16.mxu0 %v1987_v0 }
  0x65   :  { %v2193_v30 = vpack.c.bf16 %v788_v12, %v781_v9 }
  0x66   :  { %1452 = vmatmul.mubr.msk.f32.vlgmr.msra.gmra.mrb[0].mxu0 %vm77_vm2, %v1262_v19 }
  0x67   :  { %1707 = vmatpush3.bf16.msra.mxu0 %v1676_v13  ;;  %1462 = vmatprep.mubr.msk.f32.mxu0 %vm1988_vm0, %v1989_v1  ;;  %v588_v13 = vld [vmem:[#allocation8 + $0x40] sm:$0xff] }
  0x68   :  { %1708 = vmatprep.subr.bf16.mxu0 %v1987_v0  ;;  %v628_v15 = vand.u32 4294901760, %v588_v13 }
  0x6a   :  { %v2136_v18 = vsub.f32 %v588_v13, %v628_v15  ;;  %v2151_v36 = vpack.c.bf16 %v631_v16, %v628_v15  ;;  %v2183_v13 = vpack.c.bf16 %v776_v7, %v769_v6  ;;  %v789_v15 = vsub.f32 %v787_v41, %v788_v12 }
  0x6b   :  { %1710 = vmatpush3.bf16.msra.mxu0 %v1679_v17  ;;  %v718_v41 = vand.u32 4294901760, %v2102_v60  ;;  %v739_v6 = vand.u32 4294901760, %v2123_v10  ;;  %v746_v7 = vand.u32 4294901760, %v2125_v11 }
  0x6c   :  { %1711 = vmatprep.subr.bf16.mxu0 %v1987_v0  ;;  %v753_v49 = vand.u32 4294901760, %v2136_v18 }
  0x6e   :  { %1463 = vmatmul.mubr.msk.f32.vlgmr.msra.gmra.mrb[0].mxu0 %vm77_vm2, %v1262_v19  ;;  %v2138_v19 = vsub.f32 %v589_v14, %v631_v16  ;;  %v754_v51 = vsub.f32 %v2136_v18, %v753_v49  ;;  %v782_v14 = vsub.f32 %v780_v40, %v781_v9  ;;  %v711_v40 = vand.u32 4294901760, %v2098_v58 }
  0x6f   :  { %1497 = vmatprep.mubr.msk.f32.mxu0 %vm1988_vm0, %v1989_v1  ;;  %1713 = vmatpush3.bf16.msra.mxu0 %v2100_v59 }
  0x70   :  { %1714 = vmatprep.subr.bf16.mxu0 %v1987_v0  ;;  %v1772_v24 = vpack.c.bf16 %v2138_v19, %v2136_v18  ;;  %v760_v50 = vand.u32 4294901760, %v2138_v19  ;;  %v755_v53 = vand.u32 4294901760, %v754_v51  ;;  %v783_v16 = vand.u32 4294901760, %v782_v14 }
  0x71   :  { %v790_v18 = vand.u32 4294901760, %v789_v15  ;;  %v732_v51 = vand.u32 4294901760, %v2114_v5 }
  0x72   :  { %1773 = vmatpush3.bf16.msra.mxu1 %v1772_v24  ;;  %v761_v52 = vsub.f32 %v2138_v19, %v760_v50  ;;  %v795_v19 = vand.u32 4294901760, %v794_v43  ;;  %v2189_v28 = vpack.c.bf16 %v760_v50, %v753_v49  ;;  %v712_v49 = vsub.f32 %v2098_v58, %v711_v40 }
  0x73   :  { %1716 = vmatpush3.bf16.msra.mxu0 %v2107_v2  ;;  %1774 = vmatprep.subr.bf16.mxu1 %v1987_v0  ;;  %v725_v50 = vand.u32 4294901760, %v2109_v3  ;;  %v733_v4 = vsub.f32 %v2114_v5, %v732_v51 }
  0x74   :  { %1717 = vmatprep.subr.bf16.mxu0 %v1987_v0  ;;  %v762_v54 = vand.u32 4294901760, %v761_v52  ;;  %v796_v22 = vsub.f32 %v794_v43, %v795_v19  ;;  %v699_v43 = vand.u32 4294901760, %v698_v37  ;;  %v713_v55 = vand.u32 4294901760, %v712_v49 }
  0x75   :  { %v726_v63 = vsub.f32 %v2109_v3, %v725_v50  ;;  %v734_v15 = vand.u32 4294901760, %v733_v4  ;;  %v1814_v56 = vpack.c.bf16 %v732_v51, %v725_v50 }
  0x76   :  { %1776 = vmatpush3.bf16.msra.mxu1 %v1775_v39  ;;  %v2179_v62 = vpack.c.bf16 %v762_v54, %v755_v53  ;;  %v797_v24 = vand.u32 4294901760, %v796_v22  ;;  %v705_v39 = vsub.f32 %v2096_v57, %v704_v34  ;;  %v1817_v57 = vpack.c.bf16 %v746_v7, %v739_v6 }
  0x77   :  { %1719 = vmatpush3.bf16.msra.mxu0 %v2118_v8  ;;  %1777 = vmatprep.subr.bf16.mxu1 %v1987_v0  ;;  %v727_v14 = vand.u32 4294901760, %v726_v63 }
  0x78   :  { %1720 = vmatprep.subr.bf16.mxu0 %v1987_v0 }
  0x79   :  { %v1742_v5 = vpack.c.bf16 %v734_v15, %v727_v14 }
  0x7a   :  { %1779 = vmatpush3.bf16.msra.mxu1 %v1778_v42 }
  0x7b   :  { %1722 = vmatpush3.bf16.msra.mxu0 %v2143_v27  ;;  %1780 = vmatprep.subr.bf16.mxu1 %v1987_v0 }
  0x7c   :  { %1723 = vmatprep.subr.bf16.mxu0 %v1987_v0 }
  0x7e   :  { %1782 = vmatpush3.bf16.msra.mxu1 %v1781_v46  ;;  %v706_v46 = vand.u32 4294901760, %v705_v39 }
  0x7f   :  { %1725 = vmatpush3.bf16.msra.mxu0 %v2151_v36  ;;  %1783 = vmatprep.subr.bf16.mxu1 %v1987_v0 }
  0x80   :  { %1726 = vmatprep.subr.bf16.mxu0 %v1987_v0  ;;  %v1736_v54 = vpack.c.bf16 %v706_v46, %v699_v43 }
  0x83   :  { %1728 = vmatpush3.bf16.msra.mxu0 %v2158_v45 }
  0x84   :  { %1729 = vmatprep.subr.bf16.mxu0 %v1987_v0 }
  0x87   :  { %1731 = vmatpush3.bf16.msra.mxu0 %v2163_v47 }
  0x88   :  { %1732 = vmatprep.subr.bf16.mxu0 %v1987_v0 }
  0x8b   :  { %1734 = vmatpush3.bf16.msra.mxu0 %v2169_v48 }
  0x8c   :  { %1735 = vmatprep.subr.bf16.mxu0 %v1987_v0 }
 0x141   :  { %v2134_v17 = vpop.f32.mrb[0].mxu0 }
 0x142   :  { %v1464_v20 = vpop.f32.mrb[1].mxu0  ;;  %v572_v21 = vmax.f32 %v2134_v17, 1.0 }
 0x143   :  { %v802_v20 = vand.u32 4294901760, %v801_v44 }
 0x144   :  { %575 = vperm.xlu0 %1885, %v572_v21   ;;  %v2185_v21 = vpack.c.bf16 %v790_v18, %v783_v16  ;;  %v740_v16 = vsub.f32 %v2123_v10, %v739_v6  ;;  %v747_v18 = vsub.f32 %v2125_v11, %v746_v7  ;;  %v1808_v11 = vpack.c.bf16 %v704_v34, %v697_v33 }
 0x145   :  { %v803_v23 = vsub.f32 %v801_v44, %v802_v20  ;;  %v2195_v31 = vpack.c.bf16 %v802_v20, %v795_v19 }
 0x146   :  { %v741_v19 = vand.u32 4294901760, %v740_v16  ;;  %v748_v20 = vand.u32 4294901760, %v747_v18 }
 0x147   :  { %v804_v25 = vand.u32 4294901760, %v803_v23 }
 0x148   :  { %v1745_v10 = vpack.c.bf16 %v748_v20, %v741_v19 }
 0x149   :  { %v2187_v26 = vpack.c.bf16 %v804_v25, %v797_v24 }
 0x1c3   :  { %v576_v32 = vpop.permute.xlu0 %575 }
 0x1c4   :  { %1886 = vrcp.f32 %v576_v32 }
 0x1ce   :  { %v1887_v35 = vpop.eup %1886 }
 0x1cf   :  { %v579_v38 = vmul.f32 %v1887_v35, %v2134_v17  ;;  %v719_v17 = vsub.f32 %v2102_v60, %v718_v41 }
 0x1d1   :  { %v2208_v42 = vand.u32 4294901760, %v579_v38  ;;  %v720_v61 = vand.u32 4294901760, %v719_v17 }
 0x1d3   :  { %v685_v44 = vsub.f32 %v579_v38, %v2208_v42  ;;  %v1739_v12 = vpack.c.bf16 %v720_v61, %v713_v55 }
 0x1d5   :  { %v686_v52 = vand.u32 4294901760, %v685_v44  ;;  %1568 = vmatmul.mubr.f32.vlgmr.msra.gmra.mrb[0].mxu1 %v685_v44 }
 0x1d6   :  { %1785 = vmatpush3.bf16.msra.mxu1 %v2100_v59  ;;  %1602 = vmatprep.mubr.msk.f32.mxu1 %vm1988_vm0, %v1989_v1 }
 0x1d7   :  { %1786 = vmatprep.subr.bf16.mxu1 %v1987_v0  ;;  %v687_v53 = vsub.f32 %v685_v44, %v686_v52 }
 0x1d9   :  { %v688_v9 = vand.u32 4294901760, %v687_v53 }
 0x1da   :  { %1788 = vmatpush3.bf16.msra.mxu1 %v2107_v2 }
 0x1db   :  { %1498 = vmatmul.mubr.f32.vlgmr.msra.gmra.mrb[2].mxu0 %v688_v9  ;;  %1789 = vmatprep.subr.bf16.mxu1 %v1987_v0 }
 0x1dc   :  { %1737 = vmatpush3.bf16.msra.mxu0 %v1736_v54  ;;  %1532 = vmatprep.mubr.msk.f32.mxu0 %vm1988_vm0, %v1989_v1 }
 0x1dd   :  { %1738 = vmatprep.subr.bf16.mxu0 %v1987_v0 }
 0x1de   :  { %1791 = vmatpush3.bf16.msra.mxu1 %v2118_v8 }
 0x1df   :  { %1792 = vmatprep.subr.bf16.mxu1 %v1987_v0 }
 0x1e0   :  { %1740 = vmatpush3.bf16.msra.mxu0 %v1739_v12 }
 0x1e1   :  { %1741 = vmatprep.subr.bf16.mxu0 %v1987_v0 }
 0x1e2   :  { %1794 = vmatpush3.bf16.msra.mxu1 %v2143_v27 }
 0x1e3   :  { %1795 = vmatprep.subr.bf16.mxu1 %v1987_v0 }
 0x1e4   :  { %1743 = vmatpush3.bf16.msra.mxu0 %v1742_v5 }
 0x1e5   :  { %1744 = vmatprep.subr.bf16.mxu0 %v1987_v0 }
 0x1e6   :  { %1797 = vmatpush3.bf16.msra.mxu1 %v2151_v36 }
 0x1e7   :  { %1798 = vmatprep.subr.bf16.mxu1 %v1987_v0 }
 0x1e8   :  { %1746 = vmatpush3.bf16.msra.mxu0 %v1745_v10 }
 0x1e9   :  { %1747 = vmatprep.subr.bf16.mxu0 %v1987_v0 }
 0x1ea   :  { %1800 = vmatpush3.bf16.msra.mxu1 %v2158_v45 }
 0x1eb   :  { %1801 = vmatprep.subr.bf16.mxu1 %v1987_v0 }
 0x1ec   :  { %1749 = vmatpush3.bf16.msra.mxu0 %v2179_v62  ;;  %v1811_v62 = vpack.c.bf16 %v718_v41, %v711_v40 }
 0x1ed   :  { %1750 = vmatprep.subr.bf16.mxu0 %v1987_v0 }
 0x1ee   :  { %1803 = vmatpush3.bf16.msra.mxu1 %v2163_v47 }
 0x1ef   :  { %1804 = vmatprep.subr.bf16.mxu1 %v1987_v0 }
 0x1f0   :  { %1752 = vmatpush3.bf16.msra.mxu0 %v2183_v13 }
 0x1f1   :  { %1753 = vmatprep.subr.bf16.mxu0 %v1987_v0 }
 0x1f2   :  { %1806 = vmatpush3.bf16.msra.mxu1 %v2169_v48 }
 0x1f3   :  { %1807 = vmatprep.subr.bf16.mxu1 %v1987_v0 }
 0x1f4   :  { %1755 = vmatpush3.bf16.msra.mxu0 %v2185_v21 }
 0x1f5   :  { %1603 = vmatmul.mubr.f32.vlgmr.msra.gmra.mrb[0].mxu1 %v686_v52  ;;  %1756 = vmatprep.subr.bf16.mxu0 %v1987_v0 }
 0x1f6   :  { %1809 = vmatpush3.bf16.msra.mxu1 %v1808_v11  ;;  %1637 = vmatprep.mubr.msk.f32.mxu1 %vm1988_vm0, %v1989_v1 }
 0x1f7   :  { %1810 = vmatprep.subr.bf16.mxu1 %v1987_v0 }
 0x1f8   :  { %1758 = vmatpush3.bf16.msra.mxu0 %v2187_v26 }
 0x1fa   :  { %1812 = vmatpush3.bf16.msra.mxu1 %v1811_v62 }
 0x1fb   :  { %1533 = vmatmul.mubr.f32.vlgmr.msra.gmra.mrb[2].mxu0 %v2208_v42  ;;  %1813 = vmatprep.subr.bf16.mxu1 %v1987_v0 }
 0x1fe   :  { %1815 = vmatpush3.bf16.msra.mxu1 %v1814_v56 }
 0x1ff   :  { %1816 = vmatprep.subr.bf16.mxu1 %v1987_v0 }
 0x202   :  { %1818 = vmatpush3.bf16.msra.mxu1 %v1817_v57 }
 0x203   :  { %1819 = vmatprep.subr.bf16.mxu1 %v1987_v0 }
 0x206   :  { %1821 = vmatpush3.bf16.msra.mxu1 %v2189_v28 }
 0x207   :  { %1822 = vmatprep.subr.bf16.mxu1 %v1987_v0 }
 0x20a   :  { %1824 = vmatpush3.bf16.msra.mxu1 %v2191_v29 }
 0x20b   :  { %1825 = vmatprep.subr.bf16.mxu1 %v1987_v0 }
 0x20e   :  { %1827 = vmatpush3.bf16.msra.mxu1 %v2193_v30 }
 0x20f   :  { %1828 = vmatprep.subr.bf16.mxu1 %v1987_v0 }
 0x212   :  { %1830 = vmatpush3.bf16.msra.mxu1 %v2195_v31 }
 0x213   :  { %1831 = vmatprep.subr.bf16.mxu1 %v1987_v0 }
 0x215   :  { %1638 = vmatmul.mubr.f32.vlgmr.msra.gmra.mrb[0].mxu1 %v2208_v42 }
 0x216   :  { %1833 = vmatpush3.bf16.msra.mxu1 %v2100_v59  ;;  %1672 = vmatprep.mubr.msk.f32.mxu1 %vm1988_vm0, %v1989_v1  ;;  %v1266_v59 = vld [vmem:[%s2320_s3] ss:$0 sm:$0xff] }
 0x217   :  { %1834 = vmatprep.subr.bf16.mxu1 %v1987_v0 }
 0x21a   :  { %1836 = vmatpush3.bf16.msra.mxu1 %v2107_v2 }
 0x21b   :  { %1837 = vmatprep.subr.bf16.mxu1 %v1987_v0 }
 0x21e   :  { %1839 = vmatpush3.bf16.msra.mxu1 %v2118_v8 }
 0x21f   :  { %1840 = vmatprep.subr.bf16.mxu1 %v1987_v0 }
 0x222   :  { %1842 = vmatpush3.bf16.msra.mxu1 %v2143_v27 }
 0x223   :  { %1843 = vmatprep.subr.bf16.mxu1 %v1987_v0 }
 0x226   :  { %1845 = vmatpush3.bf16.msra.mxu1 %v2151_v36 }
 0x227   :  { %1846 = vmatprep.subr.bf16.mxu1 %v1987_v0 }
 0x22a   :  { %1848 = vmatpush3.bf16.msra.mxu1 %v2158_v45 }
 0x22b   :  { %1849 = vmatprep.subr.bf16.mxu1 %v1987_v0 }
 0x22e   :  { %1851 = vmatpush3.bf16.msra.mxu1 %v2163_v47 }
 0x22f   :  { %1852 = vmatprep.subr.bf16.mxu1 %v1987_v0 }
 0x232   :  { %1854 = vmatpush3.bf16.msra.mxu1 %v2169_v48 }
 0x235   :  { %1673 = vmatmul.mubr.f32.vlgmr.msra.gmra.mrb[0].mxu1 %v2208_v42 }
 0x2ce   :  { %v841_v1 = vpop.f32.mrb[2].mxu0 }
 0x2cf   :  { %v1534_v58 = vpop.f32.mrb[3].mxu0  ;;  %v1855_v60 = vadd.f32 %v1266_v59, %v841_v1 }
 0x308   :  { %v1240_v2 = vpop.f32.mrb[0].mxu1 }
 0x309   :  { %v1856_v3 = vadd.f32 %v1855_v60, %v1240_v2  ;;  %v1674_v8 = vpop.f32.mrb[1].mxu1 }
 0x30b   :  { %1244 = vst [vmem:[#allocation9] sm:$0xff] %v1856_v3 }
 0x30c   :  { %1965 = shalt.err (!%p1962_p0)
}
 0x30d   :  { %s1966_s6 = scalar_lea.hbm %s2321_s4, 128 }
 0x30e   :  { %p1967_p1 = scmp.ne.s32.totalorder %s2321_s4, %s1966_s6  ;;  %p1970_p2 = scmp.lt.u32.totalorder %s1966_s6, %s2321_s4 }
 0x310   :  { %p1972_p3 = pnand %p1970_p2, %p1967_p1 }
 0x312   :  { %1975 = shalt.err (!%p1972_p3)
}
 0x313   :  { %1254 = dma.vmem_to_hbm [thread:$0]  %s1252_s28, 128, %s2321_s4, [#allocation5]  }
 0x314   :  { %1980 = dma.done.wait [#allocation5], 128  }
 0x315   :  { %1981 = vsyncadd [#allocation5], 4294967168 }
 0x316   :  { %1258 = vsyncpa [#allocation4], 1 }
 0x317   :  { %1259 = vsyncpa [#allocation7], 1 }
 0x318   :  { %1260 = vsyncpa [#allocation5], 1 }

</bundles_post_ra>
